<compile_context>
chip_gen: v7x
topology: tpu7x:2x2x1
jax: 0.10.0
libtpu: 0.0.40
codegen_flags: <defaults>
</compile_context>

<pallas_src>
import functools

import jax
import jax.numpy as jnp
from jax import lax
from jax.experimental import pallas as pl
from jax.experimental.pallas import tpu as pltpu

BN_EPS = 1e-5


# ----------------------------------------------------------------------------
# Fused Pallas kernel: conv1+bn1+relu -> conv2+bn2+relu -> fc+relu -> out -> softmax
# ----------------------------------------------------------------------------
def _fused_forward_kernel(k2, n_batch,
                          p1_ref, w1_ref, b1_ref, g1_ref, be1_ref,
                          w2_ref, b2_ref, g2_ref, be2_ref,
                          wfc_ref, bfc_ref, wout_ref, bout_ref,
                          o_ref):
    """All operands are small VMEM-resident tiles.

    p1_ref : [P1, Cin*k1*k1]   conv1 patches, rows ordered (dh, dw, ho2, wo2, n)
    w1_ref : [Cin*k1*k1, C1]
    w2_ref : [k2*k2*C1, C2]    column order of in-kernel p2 is (dh, dw, c1)
    wfc_ref: [S*C2, U]         S = conv_out**2, row order (s, c2) -- NCHW flatten
                               order is baked into this weight at pack time.
    """
    kk2 = k2 * k2
    p1_rows = p1_ref.shape[0]
    p2_rows = p1_rows // kk2            # = N * conv_out**2
    n_sp = p2_rows // n_batch           # = conv_out**2

    # ---------------- conv1 (matmul) + folded BN1 + ReLU ----------------
    y = jnp.dot(p1_ref[...], w1_ref[...], preferred_element_type=jnp.float32)
    y = y + b1_ref[...]
    mean1 = jnp.mean(y, axis=0, keepdims=True)
    var1 = jnp.maximum(jnp.mean(y * y, axis=0, keepdims=True) - mean1 * mean1, 0.0)
    scale1 = g1_ref[...] * lax.rsqrt(var1 + BN_EPS)
    shift1 = be1_ref[...] - mean1 * scale1
    y1 = jnp.maximum(y * scale1 + shift1, 0.0)      # [P1, C1], rows (dh,dw,ho2,wo2,n)

    # ------- conv2 patches: kernel==stride -> contiguous row blocks + lane concat
    p2 = jnp.concatenate(
        [y1[b * p2_rows:(b + 1) * p2_rows, :] for b in range(kk2)], axis=1)

    # ---------------- conv2 (matmul) + folded BN2 + ReLU ----------------
    z = jnp.dot(p2, w2_ref[...], preferred_element_type=jnp.float32) + b2_ref[...]
    mean2 = jnp.mean(z, axis=0, keepdims=True)
    var2 = jnp.maximum(jnp.mean(z * z, axis=0, keepdims=True) - mean2 * mean2, 0.0)
    scale2 = g2_ref[...] * lax.rsqrt(var2 + BN_EPS)
    shift2 = be2_ref[...] - mean2 * scale2
    y2 = jnp.maximum(z * scale2 + shift2, 0.0)      # [P2, C2], rows (ho2, wo2, n)

    # ------- flatten (channels-last; NCHW order baked into wfc) -------
    x_fc = jnp.concatenate(
        [y2[s * n_batch:(s + 1) * n_batch, :] for s in range(n_sp)], axis=1)  # [N, S*C2]

    # ---------------- fc -> ReLU -> output -> softmax(dim=1) ----------------
    h = jnp.dot(x_fc, wfc_ref[...], preferred_element_type=jnp.float32) + bfc_ref[...]
    h = jnp.maximum(h, 0.0)
    logits = jnp.dot(h, wout_ref[...], preferred_element_type=jnp.float32) + bout_ref[...]
    m = jnp.max(logits, axis=1, keepdims=True)
    e = jnp.exp(logits - m)
    denom = jnp.sum(e, axis=1, keepdims=True)
    o_ref[...] = e * pl.reciprocal(denom, approx=True)


# ----------------------------------------------------------------------------
# Host-side prep (one-time weight packing + a single reshape/transpose for x)
# ----------------------------------------------------------------------------
def pack_params(params):
    """Bake all layout decisions into the weights once (free at param time)."""
    c1 = params["conv1_w"].shape[0]
    c2 = params["conv2_w"].shape[0]
    k2 = params["conv2_w"].shape[-1]
    u = params["fc_w"].shape[0]
    n_sp = params["fc_w"].shape[1] // c2          # conv_out**2

    # conv1: [C1, Cin, k1, k1] -> [Cin*k1*k1, C1]  (column order (cin, kh, kw))
    w1 = params["conv1_w"].reshape(c1, -1).T
    # conv2: [C2, C1, kh, kw] -> (kh, kw, C1, C2) -> [k2*k2*C1, C2]
    w2 = jnp.transpose(params["conv2_w"], (2, 3, 1, 0)).reshape(k2 * k2 * c1, c2)
    # fc: PyTorch flatten order of NCHW is (c2, s); kernel presents (s, c2):
    #     [U, C2*S] -> [U, C2, S] -> [S, C2, U] -> [S*C2, U]
    wfc = jnp.transpose(params["fc_w"].reshape(u, c2, n_sp), (2, 1, 0)).reshape(n_sp * c2, u)
    wout = params["out_w"].T

    row = lambda v: v.reshape(1, -1)
    return dict(
        w1=w1, b1=row(params["conv1_b"]), g1=row(params["bn1_g"]), be1=row(params["bn1_b"]),
        w2=w2, b2=row(params["conv2_b"]), g2=row(params["bn2_g"]), be2=row(params["bn2_b"]),
        wfc=wfc, bfc=row(params["fc_b"]), wout=wout, bout=row(params["out_b"]),
    )


def build_conv1_patches(x, k1, k2):
    """x NCHW -> [k2*k2*Ho2*Wo2*N, Cin*k1*k1] patch matrix (pure reshape/transpose).

    Valid because kernel == stride for both convs (non-overlapping patches) and
    the spatial dims divide evenly (true for the module defaults used here).
    Row order   : (dh, dw, ho2, wo2, n)   dh,dw = conv2 kernel offsets
    Column order: (cin, kh1, kw1)         matches conv1_w.reshape(C1, -1)
    """
    n, c, h, w = x.shape
    assert h % (k1 * k2) == 0 and w % (k1 * k2) == 0, "spatial dims must divide k1*k2"
    ho2, wo2 = h // (k1 * k2), w // (k1 * k2)
    x8 = x.reshape(n, c, ho2, k2, k1, wo2, k2, k1)
    # axes: (n=0, c=1, ho2=2, dh=3, kh1=4, wo2=5, dw=6, kw1=7)
    p = jnp.transpose(x8, (3, 6, 2, 5, 0, 1, 4, 7))
    return p.reshape(k2 * k2 * ho2 * wo2 * n, c * k1 * k1)


def two_layer_conv2d_forward(x, packed, kernels, strides):
    """Reproduces TwoLayerConv2D.forward (normalize=False, training-mode BN)."""
    # TODO(synk): general stride != kernel would need a gather-based im2col path.
    assert tuple(kernels) == tuple(strides), "fused path assumes kernel == stride"
    k1, k2 = kernels
    n = x.shape[0]
    a = packed["wout"].shape[1]

    p1 = build_conv1_patches(x, k1, k2)
    kern = functools.partial(_fused_forward_kernel, k2, n)
    return pl.pallas_call(
        kern,
        out_shape=jax.ShapeDtypeStruct((n, a), jnp.float32),
        in_specs=[pl.BlockSpec(memory_space=pltpu.MemorySpace.VMEM)] * 13,
        out_specs=pl.BlockSpec(memory_space=pltpu.MemorySpace.VMEM),
    )(p1, packed["w1"], packed["b1"], packed["g1"], packed["be1"],
      packed["w2"], packed["b2"], packed["g2"], packed["be2"],
      packed["wfc"], packed["bfc"], packed["wout"], packed["bout"])


# ----------------------------------------------------------------------------
# Plain-JAX reference (for correctness check only)
# ----------------------------------------------------------------------------
def _bn_relu_ref(y, g, b):
    mean = jnp.mean(y, axis=(0, 2, 3), keepdims=True)
    var = jnp.mean((y - mean) ** 2, axis=(0, 2, 3), keepdims=True)
    y = g.reshape(1, -1, 1, 1) * (y - mean) * lax.rsqrt(var + BN_EPS) + b.reshape(1, -1, 1, 1)
    return jnp.maximum(y, 0.0)


def reference_forward(x, params, kernels, strides):
    dn = ("NCHW", "OIHW", "NCHW")
    y = lax.conv_general_dilated(x, params["conv1_w"], (strides[0],) * 2, "VALID",
                                 dimension_numbers=dn)
    y = _bn_relu_ref(y + params["conv1_b"].reshape(1, -1, 1, 1),
                     params["bn1_g"], params["bn1_b"])
    y = lax.conv_general_dilated(y, params["conv2_w"], (strides[1],) * 2, "VALID",
                                 dimension_numbers=dn)
    y = _bn_relu_ref(y + params["conv2_b"].reshape(1, -1, 1, 1),
                     params["bn2_g"], params["bn2_b"])
    y = y.reshape(y.shape[0], -1)
    h = jnp.maximum(y @ params["fc_w"].T + params["fc_b"], 0.0)
    logits = h @ params["out_w"].T + params["out_b"]
    return jax.nn.softmax(logits, axis=1)


# ----------------------------------------------------------------------------
# Main
# ----------------------------------------------------------------------------
if __name__ == "__main__":
    # Small config consistent with the module:
    #   state_size = (4, 16, 16), filter_maps = (8, 16), kernels = (4, 2),
    #   strides = (4, 2)  ->  conv_out = 2, fc_units = 32, action_size = 4
    N, C_IN, H, W = 2, 4, 16, 16
    FILTER_MAPS = (8, 16)
    KERNELS = (4, 2)
    STRIDES = (4, 2)
    CONV_OUT = 2
    FC_UNITS = 32
    ACTION_SIZE = 4

    key = jax.random.PRNGKey(0)
    ks = jax.random.split(key, 9)

    def uinit(k, shape, fan_in):
        bound = 1.0 / float(fan_in) ** 0.5
        return jax.random.uniform(k, shape, jnp.float32, -bound, bound)

    params = {
        "conv1_w": uinit(ks[1], (FILTER_MAPS[0], C_IN, KERNELS[0], KERNELS[0]),
                         C_IN * KERNELS[0] * KERNELS[0]),
        "conv1_b": uinit(ks[2], (FILTER_MAPS[0],), C_IN * KERNELS[0] * KERNELS[0]),
        "bn1_g": jnp.ones((FILTER_MAPS[0],), jnp.float32),
        "bn1_b": jnp.zeros((FILTER_MAPS[0],), jnp.float32),
        "conv2_w": uinit(ks[3], (FILTER_MAPS[1], FILTER_MAPS[0], KERNELS[1], KERNELS[1]),
                         FILTER_MAPS[0] * KERNELS[1] * KERNELS[1]),
        "conv2_b": uinit(ks[4], (FILTER_MAPS[1],), FILTER_MAPS[0] * KERNELS[1] * KERNELS[1]),
        "bn2_g": jnp.ones((FILTER_MAPS[1],), jnp.float32),
        "bn2_b": jnp.zeros((FILTER_MAPS[1],), jnp.float32),
        "fc_w": uinit(ks[5], (FC_UNITS, FILTER_MAPS[1] * CONV_OUT ** 2),
                      FILTER_MAPS[1] * CONV_OUT ** 2),
        "fc_b": uinit(ks[6], (FC_UNITS,), FILTER_MAPS[1] * CONV_OUT ** 2),
        "out_w": uinit(ks[7], (ACTION_SIZE, FC_UNITS), FC_UNITS),
        "out_b": uinit(ks[8], (ACTION_SIZE,), FC_UNITS),
    }

    x = jax.random.normal(ks[0], (N, C_IN, H, W), jnp.float32)

    packed = pack_params(params)                       # one-time layout packing
    probs = two_layer_conv2d_forward(x, packed, KERNELS, STRIDES)
    probs = jax.block_until_ready(probs)

    assert probs.shape == (N, ACTION_SIZE)
    row_sums = jnp.sum(probs, axis=1)
    # approx=True reciprocal -> slightly looser tolerance than exact softmax
    assert bool(jnp.all(jnp.abs(row_sums - 1.0) < 1e-2)), "softmax rows must sum to 1"

    ref = reference_forward(x, params, KERNELS, STRIDES)
    max_err = float(jnp.max(jnp.abs(probs - ref)))
    assert max_err < 1e-2, f"mismatch vs reference: {max_err}"

    print("KERNEL_OK")
</pallas_src>

<mosaic_0001>
module attributes {stable_mosaic.version = 11 : i64} {
  func.func @_fused_forward_kernel(%arg0: memref<32x64xf32, #tpu.memory_space<vmem>>, %arg1: memref<64x8xf32, #tpu.memory_space<vmem>>, %arg2: memref<1x8xf32, #tpu.memory_space<vmem>>, %arg3: memref<1x8xf32, #tpu.memory_space<vmem>>, %arg4: memref<1x8xf32, #tpu.memory_space<vmem>>, %arg5: memref<32x16xf32, #tpu.memory_space<vmem>>, %arg6: memref<1x16xf32, #tpu.memory_space<vmem>>, %arg7: memref<1x16xf32, #tpu.memory_space<vmem>>, %arg8: memref<1x16xf32, #tpu.memory_space<vmem>>, %arg9: memref<64x32xf32, #tpu.memory_space<vmem>>, %arg10: memref<1x32xf32, #tpu.memory_space<vmem>>, %arg11: memref<32x4xf32, #tpu.memory_space<vmem>>, %arg12: memref<1x4xf32, #tpu.memory_space<vmem>>, %arg13: memref<2x4xf32, #tpu.memory_space<vmem>>) attributes {dimension_semantics = [], scalar_prefetch = 0 : i64, scratch_operands = 0 : i64, tpu.core_type = #tpu.core_type<tc>} {
    %c0 = arith.constant 0 : index
    %c0_0 = arith.constant 0 : index
    %0 = vector.load %arg0[%c0, %c0_0] : memref<32x64xf32, #tpu.memory_space<vmem>>, vector<32x64xf32>
    %c0_1 = arith.constant 0 : index
    %c0_2 = arith.constant 0 : index
    %1 = vector.load %arg1[%c0_1, %c0_2] : memref<64x8xf32, #tpu.memory_space<vmem>>, vector<64x8xf32>
    %cst = arith.constant dense<0.000000e+00> : vector<32x8xf32>
    %2 = tpu.matmul %0, %1, %cst {dimension_numbers = #tpu.dot_dimension_numbers<[1], [0], [0], [1], [0, 0, 1, 1], [], []>} : vector<32x64xf32>, vector<64x8xf32>, vector<32x8xf32> -> vector<32x8xf32>
    %c0_3 = arith.constant 0 : index
    %c0_4 = arith.constant 0 : index
    %3 = vector.load %arg2[%c0_3, %c0_4] : memref<1x8xf32, #tpu.memory_space<vmem>>, vector<1x8xf32>
    %4 = vector.broadcast %3 : vector<1x8xf32> to vector<32x8xf32>
    %5 = arith.addf %2, %4 : vector<32x8xf32>
    %cst_5 = arith.constant dense<0.000000e+00> : vector<8xf32>
    %6 = vector.multi_reduction <add>, %5, %cst_5 [0] : vector<32x8xf32> to vector<8xf32>
    %7 = vector.shape_cast %6 : vector<8xf32> to vector<1x8xf32>
    %cst_6 = arith.constant 3.200000e+01 : f32
    %8 = vector.broadcast %cst_6 : f32 to vector<1x8xf32>
    %9 = arith.divf %7, %8 : vector<1x8xf32>
    %10 = arith.mulf %5, %5 : vector<32x8xf32>
    %cst_7 = arith.constant dense<0.000000e+00> : vector<8xf32>
    %11 = vector.multi_reduction <add>, %10, %cst_7 [0] : vector<32x8xf32> to vector<8xf32>
    %12 = vector.shape_cast %11 : vector<8xf32> to vector<1x8xf32>
    %cst_8 = arith.constant 3.200000e+01 : f32
    %13 = vector.broadcast %cst_8 : f32 to vector<1x8xf32>
    %14 = arith.divf %12, %13 : vector<1x8xf32>
    %15 = arith.mulf %9, %9 : vector<1x8xf32>
    %16 = arith.subf %14, %15 : vector<1x8xf32>
    %cst_9 = arith.constant 0.000000e+00 : f32
    %17 = vector.broadcast %cst_9 : f32 to vector<1x8xf32>
    %18 = arith.maximumf %16, %17 : vector<1x8xf32>
    %c0_10 = arith.constant 0 : index
    %c0_11 = arith.constant 0 : index
    %19 = vector.load %arg3[%c0_10, %c0_11] : memref<1x8xf32, #tpu.memory_space<vmem>>, vector<1x8xf32>
    %cst_12 = arith.constant 9.99999974E-6 : f32
    %20 = vector.broadcast %cst_12 : f32 to vector<1x8xf32>
    %21 = arith.addf %18, %20 : vector<1x8xf32>
    %22 = math.rsqrt %21 : vector<1x8xf32>
    %23 = arith.mulf %19, %22 : vector<1x8xf32>
    %c0_13 = arith.constant 0 : index
    %c0_14 = arith.constant 0 : index
    %24 = vector.load %arg4[%c0_13, %c0_14] : memref<1x8xf32, #tpu.memory_space<vmem>>, vector<1x8xf32>
    %25 = arith.mulf %9, %23 : vector<1x8xf32>
    %26 = arith.subf %24, %25 : vector<1x8xf32>
    %27 = vector.broadcast %23 : vector<1x8xf32> to vector<32x8xf32>
    %28 = arith.mulf %5, %27 : vector<32x8xf32>
    %29 = vector.broadcast %26 : vector<1x8xf32> to vector<32x8xf32>
    %30 = arith.addf %28, %29 : vector<32x8xf32>
    %cst_15 = arith.constant 0.000000e+00 : f32
    %31 = vector.broadcast %cst_15 : f32 to vector<32x8xf32>
    %32 = arith.maximumf %30, %31 : vector<32x8xf32>
    %33 = vector.extract_strided_slice %32 {offsets = [0, 0], sizes = [8, 8], strides = [1, 1]} : vector<32x8xf32> to vector<8x8xf32>
    %34 = vector.extract_strided_slice %32 {offsets = [8, 0], sizes = [8, 8], strides = [1, 1]} : vector<32x8xf32> to vector<8x8xf32>
    %35 = vector.extract_strided_slice %32 {offsets = [16, 0], sizes = [8, 8], strides = [1, 1]} : vector<32x8xf32> to vector<8x8xf32>
    %36 = vector.extract_strided_slice %32 {offsets = [24, 0], sizes = [8, 8], strides = [1, 1]} : vector<32x8xf32> to vector<8x8xf32>
    %37 = tpu.concatenate %33, %34, %35, %36 in 1 : vector<8x8xf32>, vector<8x8xf32>, vector<8x8xf32>, vector<8x8xf32> -> vector<8x32xf32>
    %c0_16 = arith.constant 0 : index
    %c0_17 = arith.constant 0 : index
    %38 = vector.load %arg5[%c0_16, %c0_17] : memref<32x16xf32, #tpu.memory_space<vmem>>, vector<32x16xf32>
    %cst_18 = arith.constant dense<0.000000e+00> : vector<8x16xf32>
    %39 = tpu.matmul %37, %38, %cst_18 {dimension_numbers = #tpu.dot_dimension_numbers<[1], [0], [0], [1], [0, 0, 1, 1], [], []>} : vector<8x32xf32>, vector<32x16xf32>, vector<8x16xf32> -> vector<8x16xf32>
    %c0_19 = arith.constant 0 : index
    %c0_20 = arith.constant 0 : index
    %40 = vector.load %arg6[%c0_19, %c0_20] : memref<1x16xf32, #tpu.memory_space<vmem>>, vector<1x16xf32>
    %41 = vector.broadcast %40 : vector<1x16xf32> to vector<8x16xf32>
    %42 = arith.addf %39, %41 : vector<8x16xf32>
    %cst_21 = arith.constant dense<0.000000e+00> : vector<16xf32>
    %43 = vector.multi_reduction <add>, %42, %cst_21 [0] : vector<8x16xf32> to vector<16xf32>
    %44 = vector.shape_cast %43 : vector<16xf32> to vector<1x16xf32>
    %cst_22 = arith.constant 8.000000e+00 : f32
    %45 = vector.broadcast %cst_22 : f32 to vector<1x16xf32>
    %46 = arith.divf %44, %45 : vector<1x16xf32>
    %47 = arith.mulf %42, %42 : vector<8x16xf32>
    %cst_23 = arith.constant dense<0.000000e+00> : vector<16xf32>
    %48 = vector.multi_reduction <add>, %47, %cst_23 [0] : vector<8x16xf32> to vector<16xf32>
    %49 = vector.shape_cast %48 : vector<16xf32> to vector<1x16xf32>
    %cst_24 = arith.constant 8.000000e+00 : f32
    %50 = vector.broadcast %cst_24 : f32 to vector<1x16xf32>
    %51 = arith.divf %49, %50 : vector<1x16xf32>
    %52 = arith.mulf %46, %46 : vector<1x16xf32>
    %53 = arith.subf %51, %52 : vector<1x16xf32>
    %cst_25 = arith.constant 0.000000e+00 : f32
    %54 = vector.broadcast %cst_25 : f32 to vector<1x16xf32>
    %55 = arith.maximumf %53, %54 : vector<1x16xf32>
    %c0_26 = arith.constant 0 : index
    %c0_27 = arith.constant 0 : index
    %56 = vector.load %arg7[%c0_26, %c0_27] : memref<1x16xf32, #tpu.memory_space<vmem>>, vector<1x16xf32>
    %cst_28 = arith.constant 9.99999974E-6 : f32
    %57 = vector.broadcast %cst_28 : f32 to vector<1x16xf32>
    %58 = arith.addf %55, %57 : vector<1x16xf32>
    %59 = math.rsqrt %58 : vector<1x16xf32>
    %60 = arith.mulf %56, %59 : vector<1x16xf32>
    %c0_29 = arith.constant 0 : index
    %c0_30 = arith.constant 0 : index
    %61 = vector.load %arg8[%c0_29, %c0_30] : memref<1x16xf32, #tpu.memory_space<vmem>>, vector<1x16xf32>
    %62 = arith.mulf %46, %60 : vector<1x16xf32>
    %63 = arith.subf %61, %62 : vector<1x16xf32>
    %64 = vector.broadcast %60 : vector<1x16xf32> to vector<8x16xf32>
    %65 = arith.mulf %42, %64 : vector<8x16xf32>
    %66 = vector.broadcast %63 : vector<1x16xf32> to vector<8x16xf32>
    %67 = arith.addf %65, %66 : vector<8x16xf32>
    %cst_31 = arith.constant 0.000000e+00 : f32
    %68 = vector.broadcast %cst_31 : f32 to vector<8x16xf32>
    %69 = arith.maximumf %67, %68 : vector<8x16xf32>
    %70 = vector.extract_strided_slice %69 {offsets = [0, 0], sizes = [2, 16], strides = [1, 1]} : vector<8x16xf32> to vector<2x16xf32>
    %71 = vector.extract_strided_slice %69 {offsets = [2, 0], sizes = [2, 16], strides = [1, 1]} : vector<8x16xf32> to vector<2x16xf32>
    %72 = vector.extract_strided_slice %69 {offsets = [4, 0], sizes = [2, 16], strides = [1, 1]} : vector<8x16xf32> to vector<2x16xf32>
    %73 = vector.extract_strided_slice %69 {offsets = [6, 0], sizes = [2, 16], strides = [1, 1]} : vector<8x16xf32> to vector<2x16xf32>
    %74 = tpu.concatenate %70, %71, %72, %73 in 1 : vector<2x16xf32>, vector<2x16xf32>, vector<2x16xf32>, vector<2x16xf32> -> vector<2x64xf32>
    %c0_32 = arith.constant 0 : index
    %c0_33 = arith.constant 0 : index
    %75 = vector.load %arg9[%c0_32, %c0_33] : memref<64x32xf32, #tpu.memory_space<vmem>>, vector<64x32xf32>
    %cst_34 = arith.constant dense<0.000000e+00> : vector<2x32xf32>
    %76 = tpu.matmul %74, %75, %cst_34 {dimension_numbers = #tpu.dot_dimension_numbers<[1], [0], [0], [1], [0, 0, 1, 1], [], []>} : vector<2x64xf32>, vector<64x32xf32>, vector<2x32xf32> -> vector<2x32xf32>
    %c0_35 = arith.constant 0 : index
    %c0_36 = arith.constant 0 : index
    %77 = vector.load %arg10[%c0_35, %c0_36] : memref<1x32xf32, #tpu.memory_space<vmem>>, vector<1x32xf32>
    %78 = vector.broadcast %77 : vector<1x32xf32> to vector<2x32xf32>
    %79 = arith.addf %76, %78 : vector<2x32xf32>
    %cst_37 = arith.constant 0.000000e+00 : f32
    %80 = vector.broadcast %cst_37 : f32 to vector<2x32xf32>
    %81 = arith.maximumf %79, %80 : vector<2x32xf32>
    %c0_38 = arith.constant 0 : index
    %c0_39 = arith.constant 0 : index
    %82 = vector.load %arg11[%c0_38, %c0_39] : memref<32x4xf32, #tpu.memory_space<vmem>>, vector<32x4xf32>
    %cst_40 = arith.constant dense<0.000000e+00> : vector<2x4xf32>
    %83 = tpu.matmul %81, %82, %cst_40 {dimension_numbers = #tpu.dot_dimension_numbers<[1], [0], [0], [1], [0, 0, 1, 1], [], []>} : vector<2x32xf32>, vector<32x4xf32>, vector<2x4xf32> -> vector<2x4xf32>
    %c0_41 = arith.constant 0 : index
    %c0_42 = arith.constant 0 : index
    %84 = vector.load %arg12[%c0_41, %c0_42] : memref<1x4xf32, #tpu.memory_space<vmem>>, vector<1x4xf32>
    %85 = vector.broadcast %84 : vector<1x4xf32> to vector<2x4xf32>
    %86 = arith.addf %83, %85 : vector<2x4xf32>
    %cst_43 = arith.constant dense<0xFF800000> : vector<2xf32>
    %87 = vector.multi_reduction <maximumf>, %86, %cst_43 [1] : vector<2x4xf32> to vector<2xf32>
    %88 = vector.shape_cast %87 : vector<2xf32> to vector<2x1xf32>
    %89 = vector.broadcast %88 : vector<2x1xf32> to vector<2x4xf32>
    %90 = arith.subf %86, %89 : vector<2x4xf32>
    %91 = math.exp %90 : vector<2x4xf32>
    %cst_44 = arith.constant dense<0.000000e+00> : vector<2xf32>
    %92 = vector.multi_reduction <add>, %91, %cst_44 [1] : vector<2x4xf32> to vector<2xf32>
    %93 = vector.shape_cast %92 : vector<2xf32> to vector<2x1xf32>
    %94 = tpu.reciprocal %93 {approx = true} : vector<2x1xf32> -> vector<2x1xf32>
    %95 = vector.broadcast %94 : vector<2x1xf32> to vector<2x4xf32>
    %96 = arith.mulf %91, %95 : vector<2x4xf32>
    %c0_45 = arith.constant 0 : index
    %c0_46 = arith.constant 0 : index
    %97 = vector.load %arg13[%c0_45, %c0_46] : memref<2x4xf32, #tpu.memory_space<vmem>>, vector<2x4xf32>
    tpu.vector_store %arg13[%c0_45, %c0_46], %96 {strides = array<i32>} : memref<2x4xf32, #tpu.memory_space<vmem>>, vector<2x4xf32>,
    return
  }
}

</mosaic_0001>

<bundles_post_ra>
// kernel: tpu_custom_call.1
= control target key start
LH: loop header
LB: loop body
LE: loop exit
PB: predicated region body
PF: predicated region fallthrough
CT: control target
= control target key end

     0   :  { %vm64_vm0 = vcmask 523264   ;;  %s1026_s0 = inlined_call_operand.vmem [shape: f32[32,64], index: 0, kind: input, shape index: {}]   ;;  %s1027_s1 = inlined_call_operand.vmem [shape: f32[64,8], index: 1, kind: input, shape index: {}]   ;;  %s1028_s2 = inlined_call_operand.vmem [shape: f32[1,8], index: 2, kind: input, shape index: {}]   ;;  %s1029_s3 = inlined_call_operand.vmem [shape: f32[1,8], index: 3, kind: input, shape index: {}]   ;;  %s1030_s4 = inlined_call_operand.vmem [shape: f32[1,8], index: 4, kind: input, shape index: {}]   ;;  %s1031_s5 = inlined_call_operand.vmem [shape: f32[32,16], index: 5, kind: input, shape index: {}]   ;;  %s1032_s6 = inlined_call_operand.vmem [shape: f32[1,16], index: 6, kind: input, shape index: {}]   ;;  %s1033_s7 = inlined_call_operand.vmem [shape: f32[1,16], index: 7, kind: input, shape index: {}]   ;;  %s1034_s8 = inlined_call_operand.vmem [shape: f32[1,16], index: 8, kind: input, shape index: {}]   ;;  %s1035_s9 = inlined_call_operand.vmem [shape: f32[64,32], index: 9, kind: input, shape index: {}]   ;;  %s1036_s10 = inlined_call_operand.vmem [shape: f32[1,32], index: 10, kind: input, shape index: {}]   ;;  %s1037_s11 = inlined_call_operand.vmem [shape: f32[32,4], index: 11, kind: input, shape index: {}]   ;;  %s1038_s12 = inlined_call_operand.vmem [shape: f32[1,4], index: 12, kind: input, shape index: {}]   ;;  %s1039_s13 = inlined_call_operand.hbm [shape: f32[2,4], index: 13, kind: output, shape index: {}]  }
   0x1   :  { %v49_v0 = vld [vmem:[%s1027_s1] sm:$0xff]  ;;  %v50_v1 = vld [vmem:[%s1027_s1 + $0x8] sm:$0xff]  ;;  %v51_v2 = vld [vmem:[%s1027_s1 + $0x10] sm:$0xff] }
   0x2   :  { %v697_v3 = vpack.c.bf16 %v50_v1, %v49_v0  ;;  %v52_v4 = vld [vmem:[%s1027_s1 + $0x18] sm:$0xff]  ;;  %v53_v6 = vld [vmem:[%s1027_s1 + $0x20] sm:$0xff]  ;;  %v54_v7 = vld [vmem:[%s1027_s1 + $0x28] sm:$0xff] }
   0x3   :  { %v701_v5 = vpack.c.bf16 %v52_v4, %v51_v2  ;;  %v45_v8 = vld [vmem:[%s1026_s0] sm:$0xff] }
   0x4   :  { %698 = vmatprep.subr.bf16.mxu0 %v697_v3  ;;  %650 = vmatprep.mubr.msk.f32.mxu0 %vm64_vm0, %v45_v8 }
   0x5   :  { %700 = vmatpush3.bf16.msra.mxu0 %v697_v3 }
   0x6   :  { %18 = vsyncpa [#allocation3], 0  ;;  %702 = vmatprep.subr.bf16.mxu0 %v701_v5  ;;  %v705_v9 = vpack.c.bf16 %v54_v7, %v53_v6  ;;  %v55_v10 = vld [vmem:[%s1027_s1 + $0x30] sm:$0xff]  ;;  %v56_v11 = vld [vmem:[%s1027_s1 + $0x38] sm:$0xff]  ;;  %v778_v18 = vmov 0.0|0.0   ;;  %vm162_vm1 = vcmask 64512   ;;  %v207_v1 = vlaneseq }
   0x7   :  { %v709_v12 = vpack.c.bf16 %v56_v11, %v55_v10  ;;  %v46_v13 = vld [vmem:[%s1026_s0 + $0x8] sm:$0xff]  ;;  %v47_v14 = vld [vmem:[%s1026_s0 + $0x10] sm:$0xff]  ;;  %v48_v15 = vld [vmem:[%s1026_s0 + $0x18] sm:$0xff]  ;;  %713 = vmatprep.subr.bf16.mxu1 %v778_v18  ;;  %vm779_vm2 = vmmov 0   ;;  %vm243_vm3 = vcmask 130048   ;;  %vm245_vm4 = vcmask 195584  }
   0x8   :  { %v247_v16 = vld [vmem:[%s1031_s5] sm:$0xff]  ;;  %v248_v17 = vld [vmem:[%s1031_s5 + $0x8] sm:$0xff]  ;;  %v208_v2 = vshrl.u32 %v207_v1, 7  ;;  %v249_v6 = vld [vmem:[%s1031_s5 + $0x10] sm:$0xff]  ;;  %vm258_vm5 = vcmask 261120   ;;  %s785_s27 = smov 48  }
   0x9   :  { %704 = vmatpush3.bf16.msra.mxu0 %v701_v5  ;;  %v714_v19 = vpack.c.bf16 %v248_v17, %v247_v16  ;;  %v592_v20 = vld [vmem:[%s1028_s2] ss:$0 sm:$0xff]  ;;  %v250_v7 = vld [vmem:[%s1031_s5 + $0x18] sm:$0xff]  ;;  %v780_v17 = vmov 0.0   ;;  %s783_s5 = smov 16   ;;  %vm390_vm6 = vcmask 392192  }
   0xa   :  { %706 = vmatprep.subr.bf16.mxu0 %v705_v9  ;;  %v199_v3 = vld [vmem:[%s1029_s3] sm:$0x1]  ;;  %v925_v4 = vsub.s32 0, %v208_v2  ;;  %664 = vmatprep.mubr.msk.f32.mxu1 %vm779_vm2, %v780_v17  ;;  %s781_s3 = smov 24   ;;  %vm565_vm7 = vcmask 25600  }
   0xb   :  { %715 = vmatpush3.bf16.msra.mxu1 %v714_v19  ;;  %v203_v10 = vld [vmem:[%s1030_s4] sm:$0x1]  ;;  %s782_s4 = smov 8  }
   0xc   :  { %716 = vmatprep.subr.bf16.mxu1 %v778_v18 }
   0xd   :  { %708 = vmatpush3.bf16.msra.mxu0 %v705_v9  ;;  %v717_v9 = vpack.c.bf16 %v250_v7, %v249_v6  ;;  %v353_v6 = vld [vmem:[%s1033_s7] sm:$0x1] }
   0xe   :  { %710 = vmatprep.subr.bf16.mxu0 %v709_v12 }
   0xf   :  { %718 = vmatpush3.bf16.msra.mxu1 %v717_v9  ;;  %v357_v9 = vld [vmem:[%s1034_s8] sm:$0x1] }
  0x10   :  { %719 = vmatprep.subr.bf16.mxu1 %v778_v18 }
  0x11   :  { %712 = vmatpush3.bf16.msra.mxu0 %v709_v12 }
  0x12   :  { %731 = vmatprep.subr.bf16.mxu0 %v778_v18 }
  0x14   :  { %651 = vmatmul.mubr.msk.f32.vlgmr.msra.gmra.mrb[0].mxu0 %vm64_vm0, %v46_v13 }
  0x15   :  { %653 = vmatprep.mubr.msk.f32.mxu0 %vm64_vm0, %v47_v14 }
  0x18   :  { %654 = vmatmul.mubr.msk.f32.gmra.mrb[2].mxu0 %vm64_vm0, %v48_v15 }
  0x19   :  { %694 = vmatprep.mubr.msk.f32.mxu0 %vm779_vm2, %v780_v17 }
  0xe7   :  { %v652_v21 = vpop.f32.mrb[0].mxu0 }
  0xe8   :  { %v149_v22 = vadd.f32 %v652_v21, %v592_v20  ;;  %v143_v23 = vpop.f32.mrb[1].mxu0 }
  0xe9   :  { %v909_v24 = vadd.f32 %v592_v20, %v143_v23 }
  0xea   :  { %v164_v25 = vsel %vm162_vm1, %v149_v22, 0.0  ;;  %v179_v26 = vmul.f32 %v149_v22, %v149_v22 }
  0xeb   :  { %v163_v27 = vsel %vm162_vm1, %v909_v24, 0.0  ;;  %v178_v28 = vmul.f32 %v909_v24, %v909_v24  ;;  %v655_v29 = vpop.f32.mrb[2].mxu0 }
  0xec   :  { %v183_v30 = vsel %vm162_vm1, %v179_v26, 0.0  ;;  %v165_v31 = vadd.f32 %v164_v25, %v163_v27  ;;  %v159_v32 = vadd.f32 %v655_v29, %v592_v20  ;;  %v153_v33 = vpop.f32.mrb[3].mxu0 }
  0xed   :  { %v182_v34 = vsel %vm162_vm1, %v178_v28, 0.0  ;;  %v154_v35 = vadd.f32 %v592_v20, %v153_v33 }
  0xee   :  { %v184_v36 = vadd.f32 %v183_v30, %v182_v34  ;;  %v181_v37 = vmul.f32 %v159_v32, %v159_v32  ;;  %v168_v41 = vsel %vm162_vm1, %v159_v32, 0.0 }
  0xef   :  { %v166_v38 = vsel %vm162_vm1, %v154_v35, 0.0  ;;  %v180_v39 = vmul.f32 %v154_v35, %v154_v35 }
  0xf0   :  { %v167_v40 = vadd.f32 %v166_v38, %v165_v31  ;;  %v187_v45 = vsel %vm162_vm1, %v181_v37, 0.0  ;;  %v394_v37 = vld [vmem:[%s1035_s9 + $0x10] sm:$0xff] }
  0xf1   :  { %v185_v42 = vsel %vm162_vm1, %v180_v39, 0.0  ;;  %v395_v39 = vld [vmem:[%s1035_s9 + $0x18] sm:$0xff] }
  0xf2   :  { %v169_v43 = vadd.f32 %v168_v41, %v167_v40  ;;  %v186_v44 = vadd.f32 %v185_v42, %v184_v36  ;;  %v393_v36 = vld [vmem:[%s1035_s9 + $0x8] sm:$0xff]  ;;  %v723_v40 = vpack.c.bf16 %v395_v39, %v394_v37  ;;  %v396_v41 = vld [vmem:[%s1035_s9 + $0x20] sm:$0xff] }
  0xf3   :  { %v397_v42 = vld [vmem:[%s1035_s9 + $0x28] sm:$0xff]  ;;  %v601_v39 = vld [vmem:[%s1038_s12] ss:$0 sm:$0xff] }
  0xf4   :  { %v170_v46 = vrot.slane %v169_v43, 4  ;;  %v188_v47 = vadd.f32 %v187_v45, %v186_v44  ;;  %v597_v44 = vld [vmem:[%s1032_s6] ss:$0 sm:$0xff] }
  0xf6   :  { %v171_v48 = vadd.f32 %v170_v46, %v169_v43  ;;  %v189_v49 = vrot.slane %v188_v47, 4  ;;  %v726_v43 = vpack.c.bf16 %v397_v42, %v396_v41 }
  0xf8   :  { %v172_v50 = vrot.slane %v171_v48, 2  ;;  %v190_v51 = vadd.f32 %v189_v49, %v188_v47 }
  0xfa   :  { %v173_v52 = vadd.f32 %v172_v50, %v171_v48  ;;  %v191_v53 = vrot.slane %v190_v51, 2 }
  0xfc   :  { %v174_v54 = vrot.slane %v173_v52, 1  ;;  %v192_v55 = vadd.f32 %v191_v53, %v190_v51 }
  0xfe   :  { %v175_v56 = vadd.f32 %v174_v54, %v173_v52  ;;  %v193_v57 = vrot.slane %v192_v55, 1 }
 0x100   :  { %v177_v58 = vmul.f32 0.03125, %v175_v56  ;;  %v194_v59 = vadd.f32 %v193_v57, %v192_v55 }
 0x102   :  { %v195_v60 = vmul.f32 0.03125, %v194_v59  ;;  %v196_v61 = vmul.f32 %v177_v58, %v177_v58 }
 0x104   :  { %v197_v62 = vsub.f32 %v195_v60, %v196_v61 }
 0x106   :  { %v198_v63 = vmax.f32 %v197_v62, 0.0 }
 0x108   :  { %v200_v0 = vadd.f32 1e-05, %v198_v63 }
 0x10a   :  { %746 = vrsqrt.f32 %v200_v0 }
 0x114   :  { %v747_v5 = vpop.eup %746 }
 0x115   :  { %v202_v8 = vmul.f32 %v747_v5, %v199_v3 }
 0x117   :  { %v210_v11 = vrot.slane %v202_v8, %v925_v4  ;;  %v204_v12 = vmul.f32 %v202_v8, %v177_v58 }
 0x119   :  { %v214_v13 = vmul.f32 %v210_v11, %v154_v35  ;;  %v205_v14 = vsub.f32 %v203_v10, %v204_v12  ;;  %v215_v15 = vmul.f32 %v210_v11, %v159_v32  ;;  %v213_v16 = vmul.f32 %v210_v11, %v149_v22  ;;  %v392_v35 = vld [vmem:[%s1035_s9] sm:$0xff]  ;;  %v398_v10 = vld [vmem:[%s1035_s9 + $0x30] sm:$0xff] }
 0x11a   :  { %v212_v19 = vmul.f32 %v210_v11, %v909_v24  ;;  %v720_v38 = vpack.c.bf16 %v393_v36, %v392_v35  ;;  %v399_v11 = vld [vmem:[%s1035_s9 + $0x38] sm:$0xff]  ;;  %s784_s9 = smov 32  }
 0x11b   :  { %v220_v20 = vrot.slane %v205_v14, %v925_v4  ;;  %v729_v14 = vpack.c.bf16 %v399_v11, %v398_v10 }
 0x11d   :  { %v225_v21 = vadd.f32 %v220_v20, %v215_v15  ;;  %v223_v23 = vadd.f32 %v220_v20, %v213_v16  ;;  %v224_v25 = vadd.f32 %v220_v20, %v214_v13  ;;  %v222_v26 = vadd.f32 %v220_v20, %v212_v19  ;;  %v481_v19 = vld [vmem:[%s1037_s11] sm:$0xff]  ;;  %v482_v20 = vld [vmem:[%s1037_s11 + $0x8] sm:$0xff] }
 0x11f   :  { %v229_v27 = vmax.f32 %v225_v21, 0.0  ;;  %v227_v28 = vmax.f32 %v223_v23, 0.0  ;;  %v228_v22 = vmax.f32 %v224_v25, 0.0  ;;  %v226_v24 = vmax.f32 %v222_v26, 0.0 }
 0x120   :  { %v732_v21 = vpack.c.bf16 %v482_v20, %v481_v19 }
 0x121   :  { %239 = vrot.lane.b32.xlu1 %v229_v27, %s781_s3  ;;  %231 = vrot.lane.b32.xlu0 %v227_v28, %s782_s4 }
 0x122   :  { %733 = vmatpush3.bf16.msra.mxu0 %v732_v21 }
 0x123   :  { %734 = vmatprep.subr.bf16.mxu0 %v778_v18 }
 0x125   :  { %235 = vrot.lane.b32.xlu0 %v228_v22, %s783_s5 }
 0x193   :  { %v232_v29 = vpop.permute.xlu0 %231  ;;  %v240_v32 = vpop.permute.xlu1 %239 }
 0x194   :  { %v242_v30 = vsel %vm162_vm1, %v226_v24, %v232_v29 }
 0x197   :  { %v236_v31 = vpop.permute.xlu0 %235 }
 0x198   :  { %v244_v33 = vsel %vm243_vm3, %v242_v30, %v236_v31 }
 0x199   :  { %v246_v34 = vsel %vm245_vm4, %v244_v33, %v240_v32  ;;  %v484_v32 = vld [vmem:[%s1037_s11 + $0x18] sm:$0xff] }
 0x19a   :  { %665 = vmatmul.mubr.msk.f32.vlgmr.msra.gmra.mrb[0].mxu1 %vm258_vm5, %v246_v34  ;;  %v599_v34 = vld [vmem:[%s1036_s10] ss:$0 sm:$0xff]  ;;  %s786_s10 = smov [#allocation2]  }
 0x19b   :  { %683 = vmatprep.mubr.msk.f32.mxu1 %vm779_vm2, %v780_v17  ;;  %721 = vmatpush3.bf16.msra.mxu1 %v720_v38 }
 0x19c   :  { %722 = vmatprep.subr.bf16.mxu1 %v778_v18 }
 0x19f   :  { %724 = vmatpush3.bf16.msra.mxu1 %v723_v40 }
 0x1a0   :  { %725 = vmatprep.subr.bf16.mxu1 %v778_v18 }
 0x1a3   :  { %727 = vmatpush3.bf16.msra.mxu1 %v726_v43 }
 0x1a4   :  { %728 = vmatprep.subr.bf16.mxu1 %v778_v18  ;;  %v483_v18 = vld [vmem:[%s1037_s11 + $0x10] sm:$0xff]  ;;  %s584_s11 = sshll.u32 %s786_s10, 4  ;;  %s585_s11 = int_to_ptr.vmem [resolvable:$true] %s584_s11 }
 0x1a5   :  { %v735_v33 = vpack.c.bf16 %v484_v32, %v483_v18  ;;  %s754_s12 = scalar_lea.vmem %s585_s11, 32  ;;  %p759_p1 = scmp.lt.s32.totalorder %s585_s11, %s585_s11 }
 0x1a6   :  { %p755_p0 = scmp.ne.s32.totalorder %s585_s11, %s754_s12  ;;  %p760_p2 = scmp.lt.s32.totalorder %s754_s12, %s754_s12 }
 0x1a7   :  { %730 = vmatpush3.bf16.msra.mxu1 %v729_v14  ;;  %736 = vmatpush3.bf16.msra.mxu0 %v735_v33 }
 0x1a8   :  { %p761_p3 = por %p760_p2, %p759_p1 }
 0x1aa   :  { %p762_p4 = pnand %p761_p3, %p755_p0 }
 0x26d   :  { %v328_v45 = vpop.f32.mrb[0].mxu1 }
 0x26e   :  { %v329_v46 = vadd.f32 %v597_v44, %v328_v45  ;;  %v666_v47 = vpop.f32.mrb[1].mxu1 }
 0x270   :  { %v332_v48 = vsel %vm243_vm3, %v329_v46, 0.0  ;;  %v341_v49 = vmul.f32 %v329_v46, %v329_v46 }
 0x271   :  { %v333_v50 = vrot.slane %v332_v48, 4 }
 0x272   :  { %v342_v51 = vsel %vm243_vm3, %v341_v49, 0.0 }
 0x273   :  { %v334_v52 = vadd.f32 %v333_v50, %v332_v48  ;;  %v343_v53 = vrot.slane %v342_v51, 4 }
 0x275   :  { %v335_v54 = vrot.slane %v334_v52, 2  ;;  %v344_v55 = vadd.f32 %v343_v53, %v342_v51 }
 0x277   :  { %v336_v56 = vadd.f32 %v335_v54, %v334_v52  ;;  %v345_v57 = vrot.slane %v344_v55, 2 }
 0x279   :  { %v337_v58 = vrot.slane %v336_v56, 1  ;;  %v346_v59 = vadd.f32 %v345_v57, %v344_v55 }
 0x27b   :  { %v338_v60 = vadd.f32 %v337_v58, %v336_v56  ;;  %v347_v61 = vrot.slane %v346_v59, 1 }
 0x27d   :  { %v340_v62 = vmul.f32 0.125, %v338_v60  ;;  %v348_v63 = vadd.f32 %v347_v61, %v346_v59 }
 0x27f   :  { %v349_v0 = vmul.f32 0.125, %v348_v63  ;;  %v350_v1 = vmul.f32 %v340_v62, %v340_v62 }
 0x281   :  { %v351_v2 = vsub.f32 %v349_v0, %v350_v1 }
 0x283   :  { %v352_v3 = vmax.f32 %v351_v2, 0.0 }
 0x285   :  { %v354_v5 = vadd.f32 1e-05, %v352_v3 }
 0x287   :  { %748 = vrsqrt.f32 %v354_v5 }
 0x291   :  { %v749_v7 = vpop.eup %748 }
 0x292   :  { %v356_v8 = vmul.f32 %v749_v7, %v353_v6 }
 0x294   :  { %v358_v12 = vmul.f32 %v356_v8, %v340_v62  ;;  %v364_v13 = vrot.slane %v356_v8, %v925_v4 }
 0x296   :  { %v359_v15 = vsub.f32 %v357_v9, %v358_v12  ;;  %v366_v16 = vmul.f32 %v364_v13, %v329_v46 }
 0x298   :  { %v371_v17 = vrot.slane %v359_v15, %v925_v4 }
 0x29a   :  { %v373_v23 = vadd.f32 %v371_v17, %v366_v16 }
 0x29c   :  { %v374_v25 = vmax.f32 %v373_v23, 0.0 }
 0x29e   :  { %v380_v26 = vrot.slane %v374_v25, 4  ;;  %v376_v27 = vrot.slane %v374_v25, 2  ;;  %v384_v4 = vrot.slane %v374_v25, 6 }
 0x2a0   :  { %381 = vrot.lane.b32.xlu0 %v380_v26, %s784_s9  ;;  %377 = vrot.lane.b32.xlu1 %v376_v27, %s783_s5 }
 0x2a4   :  { %385 = vrot.lane.b32.xlu1 %v384_v4, %s785_s27 }
 0x312   :  { %v378_v28 = vpop.permute.xlu1 %377  ;;  %v382_v22 = vpop.permute.xlu0 %381 }
 0x313   :  { %v388_v29 = vsel %vm243_vm3, %v374_v25, %v378_v28 }
 0x314   :  { %v389_v24 = vsel %vm258_vm5, %v388_v29, %v382_v22 }
 0x316   :  { %v386_v30 = vpop.permute.xlu1 %385 }
 0x317   :  { %v391_v31 = vsel %vm390_vm6, %v389_v24, %v386_v30 }
 0x318   :  { %684 = vmatmul.mubr.msk.f32.vlgmr.msra.gmra.mrb[2].mxu1 %vm64_vm0, %v391_v31 }
 0x3eb   :  { %v476_v35 = vpop.f32.mrb[2].mxu1 }
 0x3ec   :  { %v477_v36 = vadd.f32 %v599_v34, %v476_v35  ;;  %v685_v37 = vpop.f32.mrb[3].mxu1 }
 0x3ee   :  { %v480_v38 = vmax.f32 %v477_v36, 0.0 }
 0x3f0   :  { %695 = vmatmul.mubr.msk.f32.vlgmr.msra.gmra.mrb[4].mxu0 %vm258_vm5, %v480_v38 }
 0x4c3   :  { %v561_v40 = vpop.f32.mrb[4].mxu0 }
 0x4c4   :  { %v562_v41 = vadd.f32 %v601_v39, %v561_v40  ;;  %v696_v42 = vpop.f32.mrb[5].mxu0 }
 0x4c6   :  { %v566_v43 = vsel %vm565_vm7, %v562_v41, -inf }
 0x4c7   :  { %567 = vmax.xlane.f32.xlu0 %v566_v43 }
 0x554   :  { %v568_v44 = vpop.xlane.xlu0 %567 }
 0x555   :  { %v569_v45 = vsub.f32 %v562_v41, %v568_v44 }
 0x557   :  { %v570_v46 = vmul.f32 1.442695, %v569_v45 }
 0x559   :  { %750 = vpow2.f32 %v570_v46 }
 0x563   :  { %v751_v47 = vpop.eup %750 }
 0x564   :  { %v572_v48 = vsel %vm565_vm7, %v751_v47, 0.0 }
 0x565   :  { %573 = vadd.xlane.f32.xlu1 %v572_v48 }
 0x5f2   :  { %v574_v49 = vpop.xlane.xlu1 %573 }
 0x5f3   :  { %752 = vrcp.f32 %v574_v49 }
 0x5fd   :  { %v753_v50 = vpop.eup %752 }
 0x5fe   :  { %v576_v51 = vmul.f32 %v753_v50, %v751_v47 }
 0x600   :  { %577 = vst.msk [vmem:[#allocation2] sm:$0x3] %vm565_vm7, %v576_v51 }
 0x601   :  { %765 = shalt.err (!%p762_p4)
}
 0x602   :  { %s766_s18 = scalar_lea.hbm %s1039_s13, 32 }
 0x603   :  { %p767_p5 = scmp.ne.s32.totalorder %s1039_s13, %s766_s18  ;;  %p770_p6 = scmp.lt.u32.totalorder %s766_s18, %s1039_s13 }
 0x605   :  { %p772_p7 = pnand %p770_p6, %p767_p5 }
 0x607   :  { %775 = shalt.err (!%p772_p7)
}
 0x608   :  { %587 = dma.vmem_to_hbm [thread:$0]  %s585_s11, 32, %s1039_s13, [#allocation3]  }
 0x609   :  { %776 = dma.done.wait [#allocation3], 32  }
 0x60a   :  { %777 = vsyncadd [#allocation3], 4294967264 }
 0x60b   :  { %591 = vsyncpa [#allocation3], 1 }

</bundles_post_ra>
